<compile_context>
chip_gen: v5e
topology: v5e:2x2
jax: 0.10.0
libtpu: 0.0.40
codegen_flags: <defaults>
</compile_context>

<pallas_src>
import math
from functools import partial

import numpy as np
import jax
import jax.numpy as jnp
from jax.experimental import pallas as pl
from jax.experimental.pallas import tpu as pltpu


# ------------------------- schedule glue (numpy, float64 like torch) --------
def cosine_beta_schedule(timesteps, s=0.008):
    steps = timesteps + 1
    x = np.linspace(0, timesteps, steps, dtype=np.float64)
    ac = np.cos((x / timesteps + s) / (1 + s) * math.pi * 0.5) ** 2
    ac = ac / ac[0]
    betas = 1 - ac[1:] / ac[:-1]
    return np.clip(betas, 0, 0.999)


# ------------------------- Pallas kernel ------------------------------------
def _diffusion_loss_kernel(coefa_sm, coefb_sm, lw_sm, emb_sm, w_sm,
                           x_ref, n_ref, ms_ref, out_ref, *, bt):
    # Scalar-prefetch (SMEM):
    #   coefa_sm/coefb_sm/lw_sm : (B,) f32   sqrt(ac[t]), sqrt(1-ac[t]), lw[t]/(B*C*HW)
    #   emb_sm                  : (B, C) f32 per-batch time+class+bias embedding
    #   w_sm                    : (C, C) f32 synthetic denoiser 1x1-conv weight
    # VMEM:
    #   x_ref / n_ref : (bt, C, HW) f32  raw image / gaussian noise chunk (native layout)
    #   ms_ref        : (2, HW) f32      rows = [mean_hw, 1/std_hw]   (grid-invariant)
    #   out_ref       : (8, 128) f32     per-chunk weighted-loss partial (lane-dense tile)
    i = pl.program_id(0)
    C = x_ref.shape[1]
    HW = x_ref.shape[2]

    mean = ms_ref[0:1, :]         # (1, HW)
    invstd = ms_ref[1:2, :]       # (1, HW)

    # per-lane (over HW) partial so large chunks don't collapse into one f32 too early
    acc = jnp.zeros((1, HW), jnp.float32)

    # bt is a small compile-time constant -> static unroll.  (For very large B the
    # right move is more grid steps, not a bigger bt.)
    for b in range(bt):
        bg = i * bt + b                       # global batch index (traced scalar)
        sa = coefa_sm[bg]                     # sqrt(alphas_cumprod[t_b])
        sb = coefb_sm[bg]                     # sqrt(1 - alphas_cumprod[t_b])
        wt = lw_sm[bg]                        # loss_weight[t_b] / (B*C*HW)

        x = x_ref[b]                          # (C, HW) f32
        n = n_ref[b]                          # (C, HW) f32

        # fused _normalize + q_sample (single VPU pass over the chunk)
        xt = (x - mean) * invstd * sa + sb * n

        # synthetic denoiser: 1x1 channel mix as C*C broadcast-FMAs on the VPU with
        # weights from SMEM (an MXU (C,C)@(C,HW) matmul is <4/256 utilized at C=4),
        # plus the per-(batch, channel) embedding.  objective == 'pred_noise':
        # target = noise.  Channels are reduced first, loss_weight applied once.
        csum = jnp.zeros((1, HW), jnp.float32)
        for o in range(C):
            h_o = jnp.zeros((1, HW), jnp.float32)
            for c in range(C):
                h_o = h_o + w_sm[o, c] * xt[c:c + 1, :]
            d_o = h_o + emb_sm[bg, o] - n[o:o + 1, :]
            csum = csum + d_o * d_o
        acc = acc + wt * csum

    # single unmasked store of a lane-dense tile; wrapper reads element [0, 0]
    out_ref[...] = jnp.sum(acc) * jnp.ones(out_ref.shape, jnp.float32)


# ------------------------- generation-aware chunking ------------------------
def _vmem_capacity_bytes():
    try:
        info = pltpu.get_tpu_info()
        for attr in ("vmem_capacity_bytes", "vmem_bytes", "vmem_size_bytes"):
            v = getattr(info, attr, None)
            if v:
                return int(v)
    except Exception:
        pass
    return 64 * 1024 * 1024        # conservative: v7x per-TensorCore VMEM


def _is_multi_tensorcore():
    # Only used to decide whether to force >=2 chunks (megacore sharding on v7x).
    try:
        info = pltpu.get_tpu_info()
        for attr in ("num_cores", "core_count", "num_tensorcores"):
            v = getattr(info, attr, None)
            if v and int(v) >= 2:
                return True
    except Exception:
        pass
    try:
        kind = jax.devices()[0].device_kind.lower().replace(" ", "")
        return ("v7" in kind) or ("tpu7" in kind)
    except Exception:
        return False


def _choose_batch_chunk(B, C, HW):
    vmem_cap = _vmem_capacity_bytes()
    if vmem_cap <= 64 * 1024 * 1024:                      # v7x-class: 64 MiB physical
        budget, vmem_limit = 20 * 1024 * 1024, 32 * 1024 * 1024
    else:                                                  # v5e / v6e: 128 MiB physical
        budget, vmem_limit = 56 * 1024 * 1024, 96 * 1024 * 1024
    # per batch element: img + noise f32, double-buffered (2 arrays x 2 buffers),
    # plus ~5 live f32 (C, HW) temporaries (xt, h, d, partials) inside the loop.
    bytes_per_b = C * HW * 4 * (2 * 2 + 5)
    bt = max(1, min(B, budget // max(bytes_per_b, 1)))
    if _is_multi_tensorcore() and B >= 2:
        bt = min(bt, max(1, B // 2))   # >=2 chunks so the 'parallel' axis spans both TCs
    while B % bt != 0:                 # equal-sized chunks (no ragged last block)
        bt -= 1
    return bt, B // bt, vmem_limit


# ------------------------- wrapper -------------------------------------------
def diffusion_p_losses(img, noise, mean_flat, invstd_flat, w_mix, emb,
                       coefa, coefb, lw):
    B, C, H, Wd = img.shape
    HW = H * Wd

    # Native (B, C, HW) f32 layout: the reshape is metadata-only, no transpose,
    # no bf16 cast -- the two large inputs are read exactly once from HBM.
    x3 = img.reshape(B, C, HW).astype(jnp.float32)
    n3 = noise.reshape(B, C, HW).astype(jnp.float32)

    # Only per-HW data goes to VMEM as a (tiny, grid-invariant) block.
    ms = jnp.stack([mean_flat.astype(jnp.float32),
                    invstd_flat.astype(jnp.float32)], axis=0)          # (2, HW)
    # Per-batch scalars (loss_weight pre-folded with the 1/(B*C*HW) mean) -> SMEM.
    lw_scaled = lw.astype(jnp.float32) / (B * C * HW)                   # (B,)

    bt, n_chunks, vmem_limit = _choose_batch_chunk(B, C, HW)

    out = pl.pallas_call(
        partial(_diffusion_loss_kernel, bt=bt),
        out_shape=jax.ShapeDtypeStruct((n_chunks, 8, 128), jnp.float32),
        grid_spec=pltpu.PrefetchScalarGridSpec(
            num_scalar_prefetch=5,          # coefa, coefb, lw, emb, w_mix -> SMEM
            grid=(n_chunks,),
            in_specs=[
                pl.BlockSpec((bt, C, HW), lambda i, *_: (i, 0, 0)),    # img chunk
                pl.BlockSpec((bt, C, HW), lambda i, *_: (i, 0, 0)),    # noise chunk
                pl.BlockSpec((2, HW), lambda i, *_: (0, 0)),           # [mean, 1/std]
            ],
            out_specs=pl.BlockSpec((pl.Squeezed(), 8, 128),
                                   lambda i, *_: (i, 0, 0)),
        ),
        compiler_params=pltpu.CompilerParams(
            dimension_semantics=("parallel",),
            vmem_limit_bytes=vmem_limit,
        ),
    )(coefa.astype(jnp.float32), coefb.astype(jnp.float32), lw_scaled,
      emb.astype(jnp.float32), w_mix.astype(jnp.float32),
      x3, n3, ms)

    # Per-chunk partials already include loss_weight and the 1/(B*C*HW) mean;
    # only n_chunks scalars are summed host-side.
    return jnp.sum(out[:, 0, 0])


# ------------------------- demo / self-check --------------------------------
if __name__ == "__main__":
    key = jax.random.PRNGKey(0)
    B, C, H, W = 2, 4, 16, 16
    T = 1000
    NUM_CLASSES = 10

    (k_img, k_t, k_noise, k_w, k_b, k_cemb, k_cls,
     k_mean, k_std) = jax.random.split(key, 9)

    img = jax.random.normal(k_img, (B, C, H, W), jnp.float32)
    classes = jax.random.randint(k_cls, (B,), 0, NUM_CLASSES)

    # --- GaussianDiffusion buffers (cosine schedule, objective='pred_noise')
    betas = cosine_beta_schedule(T)
    alphas = 1.0 - betas
    alphas_cumprod = np.cumprod(alphas)
    sqrt_alphas_cumprod = np.sqrt(alphas_cumprod).astype(np.float32)
    sqrt_one_minus_alphas_cumprod = np.sqrt(1.0 - alphas_cumprod).astype(np.float32)
    snr = alphas_cumprod / (1.0 - alphas_cumprod)
    loss_weight = (snr / snr).astype(np.float32)     # pred_noise, min_snr off -> ones

    # standardize buffers, reshape(1, 1, -1, 1) convention from _set_mean_std
    standardize_mean = 0.1 * jax.random.normal(k_mean, (1, 1, H, 1), jnp.float32)
    standardize_std = 1.0 + 0.1 * jax.random.uniform(k_std, (1, 1, H, 1), jnp.float32)

    # synthetic denoiser parameters (deterministic init)
    w_mix = 0.2 * jax.random.normal(k_w, (C, C), jnp.float32)
    bias = 0.05 * jax.random.normal(k_b, (C,), jnp.float32)
    class_emb_table = 0.1 * jax.random.normal(k_cemb, (NUM_CLASSES, C), jnp.float32)
    time_freqs = jnp.exp(-jnp.arange(C, dtype=jnp.float32))

    # --- forward(): random timesteps + noise, gather schedule coefficients
    t = jax.random.randint(k_t, (B,), 0, T)
    noise = jax.random.normal(k_noise, (B, C, H, W), jnp.float32)

    coefa = jnp.asarray(sqrt_alphas_cumprod)[t]
    coefb = jnp.asarray(sqrt_one_minus_alphas_cumprod)[t]
    lw = jnp.asarray(loss_weight)[t]

    time_emb = jnp.sin(t.astype(jnp.float32)[:, None] * time_freqs[None, :])  # (B, C)
    emb = time_emb + class_emb_table[classes] + bias[None, :]                  # (B, C)

    mean_hw = jnp.broadcast_to(standardize_mean[0, 0], (H, W))
    std_hw = jnp.broadcast_to(standardize_std[0, 0], (H, W))
    mean_flat = mean_hw.reshape(H * W)
    invstd_flat = (1.0 / std_hw).reshape(H * W)

    loss = diffusion_p_losses(img, noise, mean_flat, invstd_flat, w_mix, emb,
                              coefa, coefb, lw)
    loss = jax.block_until_ready(loss)

    # pure-JAX f32 reference of the same forward pass (no bf16 rounding anywhere)
    xn = (img - standardize_mean) / standardize_std
    xt = coefa[:, None, None, None] * xn + coefb[:, None, None, None] * noise
    h = jnp.einsum('oc,bchw->bohw', w_mix, xt,
                   precision=jax.lax.Precision.HIGHEST) + emb[:, :, None, None]
    mse_b = jnp.mean((h - noise) ** 2, axis=(1, 2, 3))
    ref = jnp.mean(mse_b * lw)

    assert bool(jnp.isfinite(loss))
    assert jnp.allclose(loss, ref, rtol=1e-4, atol=1e-6), (float(loss), float(ref))
    print("KERNEL_OK")
</pallas_src>

<mosaic_0001>
module attributes {stable_mosaic.version = 11 : i64} {
  func.func @_diffusion_loss_kernel(%arg0: i32, %arg1: memref<2xf32, #tpu.memory_space<smem>>, %arg2: memref<2xf32, #tpu.memory_space<smem>>, %arg3: memref<2xf32, #tpu.memory_space<smem>>, %arg4: memref<2x4xf32, #tpu.memory_space<smem>>, %arg5: memref<4x4xf32, #tpu.memory_space<smem>>, %arg6: memref<2x4x256xf32, #tpu.memory_space<vmem>>, %arg7: memref<2x4x256xf32, #tpu.memory_space<vmem>>, %arg8: memref<2x256xf32, #tpu.memory_space<vmem>>, %arg9: memref<1x8x128xf32, #tpu.memory_space<vmem>>) attributes {dimension_semantics = [#tpu.dimension_semantics<parallel>], iteration_bounds = array<i64: 1>, scalar_prefetch = 5 : i64, scratch_operands = 0 : i64, tpu.core_type = #tpu.core_type<tc>, window_params = [{transform_indices = @transform_0, window_bounds = array<i64: 2, 4, 256>}, {transform_indices = @transform_1, window_bounds = array<i64: 2, 4, 256>}, {pipeline_mode = #tpu.pipeline_mode<synchronous>, transform_indices = @transform_2, window_bounds = array<i64: 2, 256>}, {transform_indices = @transform_3, window_bounds = array<i64: 1, 8, 128>}]} {
    %c0 = arith.constant 0 : index
    %c0_0 = arith.constant 0 : index
    %0 = vector.load %arg8[%c0, %c0_0] : memref<2x256xf32, #tpu.memory_space<vmem>>, vector<1x256xf32>
    %c1 = arith.constant 1 : index
    %c0_1 = arith.constant 0 : index
    %1 = vector.load %arg8[%c1, %c0_1] : memref<2x256xf32, #tpu.memory_space<vmem>>, vector<1x256xf32>
    %cst = arith.constant 0.000000e+00 : f32
    %2 = vector.broadcast %cst : f32 to vector<1x256xf32>
    %c2_i32 = arith.constant 2 : i32
    %3 = arith.muli %arg0, %c2_i32 : i32
    %c0_i32 = arith.constant 0 : i32
    %4 = arith.addi %3, %c0_i32 : i32
    %5 = arith.index_cast %4 : i32 to index
    %6 = memref.load %arg1[%5] : memref<2xf32, #tpu.memory_space<smem>>
    %7 = arith.index_cast %4 : i32 to index
    %8 = memref.load %arg2[%7] : memref<2xf32, #tpu.memory_space<smem>>
    %9 = arith.index_cast %4 : i32 to index
    %10 = memref.load %arg3[%9] : memref<2xf32, #tpu.memory_space<smem>>
    %c0_2 = arith.constant 0 : index
    %c0_3 = arith.constant 0 : index
    %c0_4 = arith.constant 0 : index
    %11 = vector.load %arg6[%c0_2, %c0_3, %c0_4] : memref<2x4x256xf32, #tpu.memory_space<vmem>>, vector<1x4x256xf32>
    %12 = vector.shape_cast %11 : vector<1x4x256xf32> to vector<4x256xf32>
    %c0_5 = arith.constant 0 : index
    %c0_6 = arith.constant 0 : index
    %c0_7 = arith.constant 0 : index
    %13 = vector.load %arg7[%c0_5, %c0_6, %c0_7] : memref<2x4x256xf32, #tpu.memory_space<vmem>>, vector<1x4x256xf32>
    %14 = vector.shape_cast %13 : vector<1x4x256xf32> to vector<4x256xf32>
    %15 = vector.broadcast %0 : vector<1x256xf32> to vector<4x256xf32>
    %16 = arith.subf %12, %15 : vector<4x256xf32>
    %17 = vector.broadcast %1 : vector<1x256xf32> to vector<4x256xf32>
    %18 = arith.mulf %16, %17 : vector<4x256xf32>
    %19 = vector.broadcast %6 : f32 to vector<4x256xf32>
    %20 = arith.mulf %18, %19 : vector<4x256xf32>
    %21 = vector.broadcast %8 : f32 to vector<4x256xf32>
    %22 = arith.mulf %21, %14 : vector<4x256xf32>
    %23 = arith.addf %20, %22 : vector<4x256xf32>
    %cst_8 = arith.constant 0.000000e+00 : f32
    %24 = vector.broadcast %cst_8 : f32 to vector<1x256xf32>
    %cst_9 = arith.constant 0.000000e+00 : f32
    %25 = vector.broadcast %cst_9 : f32 to vector<1x256xf32>
    %c0_10 = arith.constant 0 : index
    %c0_11 = arith.constant 0 : index
    %26 = memref.load %arg5[%c0_10, %c0_11] : memref<4x4xf32, #tpu.memory_space<smem>>
    %27 = vector.extract_strided_slice %23 {offsets = [0, 0], sizes = [1, 256], strides = [1, 1]} : vector<4x256xf32> to vector<1x256xf32>
    %28 = vector.broadcast %26 : f32 to vector<1x256xf32>
    %29 = arith.mulf %28, %27 : vector<1x256xf32>
    %30 = arith.addf %25, %29 : vector<1x256xf32>
    %c0_12 = arith.constant 0 : index
    %c1_13 = arith.constant 1 : index
    %31 = memref.load %arg5[%c0_12, %c1_13] : memref<4x4xf32, #tpu.memory_space<smem>>
    %32 = vector.extract_strided_slice %23 {offsets = [1, 0], sizes = [1, 256], strides = [1, 1]} : vector<4x256xf32> to vector<1x256xf32>
    %33 = vector.broadcast %31 : f32 to vector<1x256xf32>
    %34 = arith.mulf %33, %32 : vector<1x256xf32>
    %35 = arith.addf %30, %34 : vector<1x256xf32>
    %c0_14 = arith.constant 0 : index
    %c2 = arith.constant 2 : index
    %36 = memref.load %arg5[%c0_14, %c2] : memref<4x4xf32, #tpu.memory_space<smem>>
    %37 = vector.extract_strided_slice %23 {offsets = [2, 0], sizes = [1, 256], strides = [1, 1]} : vector<4x256xf32> to vector<1x256xf32>
    %38 = vector.broadcast %36 : f32 to vector<1x256xf32>
    %39 = arith.mulf %38, %37 : vector<1x256xf32>
    %40 = arith.addf %35, %39 : vector<1x256xf32>
    %c0_15 = arith.constant 0 : index
    %c3 = arith.constant 3 : index
    %41 = memref.load %arg5[%c0_15, %c3] : memref<4x4xf32, #tpu.memory_space<smem>>
    %42 = vector.extract_strided_slice %23 {offsets = [3, 0], sizes = [1, 256], strides = [1, 1]} : vector<4x256xf32> to vector<1x256xf32>
    %43 = vector.broadcast %41 : f32 to vector<1x256xf32>
    %44 = arith.mulf %43, %42 : vector<1x256xf32>
    %45 = arith.addf %40, %44 : vector<1x256xf32>
    %46 = arith.index_cast %4 : i32 to index
    %c0_16 = arith.constant 0 : index
    %47 = memref.load %arg4[%46, %c0_16] : memref<2x4xf32, #tpu.memory_space<smem>>
    %48 = vector.broadcast %47 : f32 to vector<1x256xf32>
    %49 = arith.addf %45, %48 : vector<1x256xf32>
    %50 = vector.extract_strided_slice %14 {offsets = [0, 0], sizes = [1, 256], strides = [1, 1]} : vector<4x256xf32> to vector<1x256xf32>
    %51 = arith.subf %49, %50 : vector<1x256xf32>
    %52 = arith.mulf %51, %51 : vector<1x256xf32>
    %53 = arith.addf %24, %52 : vector<1x256xf32>
    %cst_17 = arith.constant 0.000000e+00 : f32
    %54 = vector.broadcast %cst_17 : f32 to vector<1x256xf32>
    %c1_18 = arith.constant 1 : index
    %c0_19 = arith.constant 0 : index
    %55 = memref.load %arg5[%c1_18, %c0_19] : memref<4x4xf32, #tpu.memory_space<smem>>
    %56 = vector.extract_strided_slice %23 {offsets = [0, 0], sizes = [1, 256], strides = [1, 1]} : vector<4x256xf32> to vector<1x256xf32>
    %57 = vector.broadcast %55 : f32 to vector<1x256xf32>
    %58 = arith.mulf %57, %56 : vector<1x256xf32>
    %59 = arith.addf %54, %58 : vector<1x256xf32>
    %c1_20 = arith.constant 1 : index
    %c1_21 = arith.constant 1 : index
    %60 = memref.load %arg5[%c1_20, %c1_21] : memref<4x4xf32, #tpu.memory_space<smem>>
    %61 = vector.extract_strided_slice %23 {offsets = [1, 0], sizes = [1, 256], strides = [1, 1]} : vector<4x256xf32> to vector<1x256xf32>
    %62 = vector.broadcast %60 : f32 to vector<1x256xf32>
    %63 = arith.mulf %62, %61 : vector<1x256xf32>
    %64 = arith.addf %59, %63 : vector<1x256xf32>
    %c1_22 = arith.constant 1 : index
    %c2_23 = arith.constant 2 : index
    %65 = memref.load %arg5[%c1_22, %c2_23] : memref<4x4xf32, #tpu.memory_space<smem>>
    %66 = vector.extract_strided_slice %23 {offsets = [2, 0], sizes = [1, 256], strides = [1, 1]} : vector<4x256xf32> to vector<1x256xf32>
    %67 = vector.broadcast %65 : f32 to vector<1x256xf32>
    %68 = arith.mulf %67, %66 : vector<1x256xf32>
    %69 = arith.addf %64, %68 : vector<1x256xf32>
    %c1_24 = arith.constant 1 : index
    %c3_25 = arith.constant 3 : index
    %70 = memref.load %arg5[%c1_24, %c3_25] : memref<4x4xf32, #tpu.memory_space<smem>>
    %71 = vector.extract_strided_slice %23 {offsets = [3, 0], sizes = [1, 256], strides = [1, 1]} : vector<4x256xf32> to vector<1x256xf32>
    %72 = vector.broadcast %70 : f32 to vector<1x256xf32>
    %73 = arith.mulf %72, %71 : vector<1x256xf32>
    %74 = arith.addf %69, %73 : vector<1x256xf32>
    %75 = arith.index_cast %4 : i32 to index
    %c1_26 = arith.constant 1 : index
    %76 = memref.load %arg4[%75, %c1_26] : memref<2x4xf32, #tpu.memory_space<smem>>
    %77 = vector.broadcast %76 : f32 to vector<1x256xf32>
    %78 = arith.addf %74, %77 : vector<1x256xf32>
    %79 = vector.extract_strided_slice %14 {offsets = [1, 0], sizes = [1, 256], strides = [1, 1]} : vector<4x256xf32> to vector<1x256xf32>
    %80 = arith.subf %78, %79 : vector<1x256xf32>
    %81 = arith.mulf %80, %80 : vector<1x256xf32>
    %82 = arith.addf %53, %81 : vector<1x256xf32>
    %cst_27 = arith.constant 0.000000e+00 : f32
    %83 = vector.broadcast %cst_27 : f32 to vector<1x256xf32>
    %c2_28 = arith.constant 2 : index
    %c0_29 = arith.constant 0 : index
    %84 = memref.load %arg5[%c2_28, %c0_29] : memref<4x4xf32, #tpu.memory_space<smem>>
    %85 = vector.extract_strided_slice %23 {offsets = [0, 0], sizes = [1, 256], strides = [1, 1]} : vector<4x256xf32> to vector<1x256xf32>
    %86 = vector.broadcast %84 : f32 to vector<1x256xf32>
    %87 = arith.mulf %86, %85 : vector<1x256xf32>
    %88 = arith.addf %83, %87 : vector<1x256xf32>
    %c2_30 = arith.constant 2 : index
    %c1_31 = arith.constant 1 : index
    %89 = memref.load %arg5[%c2_30, %c1_31] : memref<4x4xf32, #tpu.memory_space<smem>>
    %90 = vector.extract_strided_slice %23 {offsets = [1, 0], sizes = [1, 256], strides = [1, 1]} : vector<4x256xf32> to vector<1x256xf32>
    %91 = vector.broadcast %89 : f32 to vector<1x256xf32>
    %92 = arith.mulf %91, %90 : vector<1x256xf32>
    %93 = arith.addf %88, %92 : vector<1x256xf32>
    %c2_32 = arith.constant 2 : index
    %c2_33 = arith.constant 2 : index
    %94 = memref.load %arg5[%c2_32, %c2_33] : memref<4x4xf32, #tpu.memory_space<smem>>
    %95 = vector.extract_strided_slice %23 {offsets = [2, 0], sizes = [1, 256], strides = [1, 1]} : vector<4x256xf32> to vector<1x256xf32>
    %96 = vector.broadcast %94 : f32 to vector<1x256xf32>
    %97 = arith.mulf %96, %95 : vector<1x256xf32>
    %98 = arith.addf %93, %97 : vector<1x256xf32>
    %c2_34 = arith.constant 2 : index
    %c3_35 = arith.constant 3 : index
    %99 = memref.load %arg5[%c2_34, %c3_35] : memref<4x4xf32, #tpu.memory_space<smem>>
    %100 = vector.extract_strided_slice %23 {offsets = [3, 0], sizes = [1, 256], strides = [1, 1]} : vector<4x256xf32> to vector<1x256xf32>
    %101 = vector.broadcast %99 : f32 to vector<1x256xf32>
    %102 = arith.mulf %101, %100 : vector<1x256xf32>
    %103 = arith.addf %98, %102 : vector<1x256xf32>
    %104 = arith.index_cast %4 : i32 to index
    %c2_36 = arith.constant 2 : index
    %105 = memref.load %arg4[%104, %c2_36] : memref<2x4xf32, #tpu.memory_space<smem>>
    %106 = vector.broadcast %105 : f32 to vector<1x256xf32>
    %107 = arith.addf %103, %106 : vector<1x256xf32>
    %108 = vector.extract_strided_slice %14 {offsets = [2, 0], sizes = [1, 256], strides = [1, 1]} : vector<4x256xf32> to vector<1x256xf32>
    %109 = arith.subf %107, %108 : vector<1x256xf32>
    %110 = arith.mulf %109, %109 : vector<1x256xf32>
    %111 = arith.addf %82, %110 : vector<1x256xf32>
    %cst_37 = arith.constant 0.000000e+00 : f32
    %112 = vector.broadcast %cst_37 : f32 to vector<1x256xf32>
    %c3_38 = arith.constant 3 : index
    %c0_39 = arith.constant 0 : index
    %113 = memref.load %arg5[%c3_38, %c0_39] : memref<4x4xf32, #tpu.memory_space<smem>>
    %114 = vector.extract_strided_slice %23 {offsets = [0, 0], sizes = [1, 256], strides = [1, 1]} : vector<4x256xf32> to vector<1x256xf32>
    %115 = vector.broadcast %113 : f32 to vector<1x256xf32>
    %116 = arith.mulf %115, %114 : vector<1x256xf32>
    %117 = arith.addf %112, %116 : vector<1x256xf32>
    %c3_40 = arith.constant 3 : index
    %c1_41 = arith.constant 1 : index
    %118 = memref.load %arg5[%c3_40, %c1_41] : memref<4x4xf32, #tpu.memory_space<smem>>
    %119 = vector.extract_strided_slice %23 {offsets = [1, 0], sizes = [1, 256], strides = [1, 1]} : vector<4x256xf32> to vector<1x256xf32>
    %120 = vector.broadcast %118 : f32 to vector<1x256xf32>
    %121 = arith.mulf %120, %119 : vector<1x256xf32>
    %122 = arith.addf %117, %121 : vector<1x256xf32>
    %c3_42 = arith.constant 3 : index
    %c2_43 = arith.constant 2 : index
    %123 = memref.load %arg5[%c3_42, %c2_43] : memref<4x4xf32, #tpu.memory_space<smem>>
    %124 = vector.extract_strided_slice %23 {offsets = [2, 0], sizes = [1, 256], strides = [1, 1]} : vector<4x256xf32> to vector<1x256xf32>
    %125 = vector.broadcast %123 : f32 to vector<1x256xf32>
    %126 = arith.mulf %125, %124 : vector<1x256xf32>
    %127 = arith.addf %122, %126 : vector<1x256xf32>
    %c3_44 = arith.constant 3 : index
    %c3_45 = arith.constant 3 : index
    %128 = memref.load %arg5[%c3_44, %c3_45] : memref<4x4xf32, #tpu.memory_space<smem>>
    %129 = vector.extract_strided_slice %23 {offsets = [3, 0], sizes = [1, 256], strides = [1, 1]} : vector<4x256xf32> to vector<1x256xf32>
    %130 = vector.broadcast %128 : f32 to vector<1x256xf32>
    %131 = arith.mulf %130, %129 : vector<1x256xf32>
    %132 = arith.addf %127, %131 : vector<1x256xf32>
    %133 = arith.index_cast %4 : i32 to index
    %c3_46 = arith.constant 3 : index
    %134 = memref.load %arg4[%133, %c3_46] : memref<2x4xf32, #tpu.memory_space<smem>>
    %135 = vector.broadcast %134 : f32 to vector<1x256xf32>
    %136 = arith.addf %132, %135 : vector<1x256xf32>
    %137 = vector.extract_strided_slice %14 {offsets = [3, 0], sizes = [1, 256], strides = [1, 1]} : vector<4x256xf32> to vector<1x256xf32>
    %138 = arith.subf %136, %137 : vector<1x256xf32>
    %139 = arith.mulf %138, %138 : vector<1x256xf32>
    %140 = arith.addf %111, %139 : vector<1x256xf32>
    %141 = vector.broadcast %10 : f32 to vector<1x256xf32>
    %142 = arith.mulf %141, %140 : vector<1x256xf32>
    %143 = arith.addf %2, %142 : vector<1x256xf32>
    %c2_i32_47 = arith.constant 2 : i32
    %144 = arith.muli %arg0, %c2_i32_47 : i32
    %c1_i32 = arith.constant 1 : i32
    %145 = arith.addi %144, %c1_i32 : i32
    %146 = arith.index_cast %145 : i32 to index
    %147 = memref.load %arg1[%146] : memref<2xf32, #tpu.memory_space<smem>>
    %148 = arith.index_cast %145 : i32 to index
    %149 = memref.load %arg2[%148] : memref<2xf32, #tpu.memory_space<smem>>
    %150 = arith.index_cast %145 : i32 to index
    %151 = memref.load %arg3[%150] : memref<2xf32, #tpu.memory_space<smem>>
    %c1_48 = arith.constant 1 : index
    %c0_49 = arith.constant 0 : index
    %c0_50 = arith.constant 0 : index
    %152 = vector.load %arg6[%c1_48, %c0_49, %c0_50] : memref<2x4x256xf32, #tpu.memory_space<vmem>>, vector<1x4x256xf32>
    %153 = vector.shape_cast %152 : vector<1x4x256xf32> to vector<4x256xf32>
    %c1_51 = arith.constant 1 : index
    %c0_52 = arith.constant 0 : index
    %c0_53 = arith.constant 0 : index
    %154 = vector.load %arg7[%c1_51, %c0_52, %c0_53] : memref<2x4x256xf32, #tpu.memory_space<vmem>>, vector<1x4x256xf32>
    %155 = vector.shape_cast %154 : vector<1x4x256xf32> to vector<4x256xf32>
    %156 = vector.broadcast %0 : vector<1x256xf32> to vector<4x256xf32>
    %157 = arith.subf %153, %156 : vector<4x256xf32>
    %158 = vector.broadcast %1 : vector<1x256xf32> to vector<4x256xf32>
    %159 = arith.mulf %157, %158 : vector<4x256xf32>
    %160 = vector.broadcast %147 : f32 to vector<4x256xf32>
    %161 = arith.mulf %159, %160 : vector<4x256xf32>
    %162 = vector.broadcast %149 : f32 to vector<4x256xf32>
    %163 = arith.mulf %162, %155 : vector<4x256xf32>
    %164 = arith.addf %161, %163 : vector<4x256xf32>
    %cst_54 = arith.constant 0.000000e+00 : f32
    %165 = vector.broadcast %cst_54 : f32 to vector<1x256xf32>
    %cst_55 = arith.constant 0.000000e+00 : f32
    %166 = vector.broadcast %cst_55 : f32 to vector<1x256xf32>
    %c0_56 = arith.constant 0 : index
    %c0_57 = arith.constant 0 : index
    %167 = memref.load %arg5[%c0_56, %c0_57] : memref<4x4xf32, #tpu.memory_space<smem>>
    %168 = vector.extract_strided_slice %164 {offsets = [0, 0], sizes = [1, 256], strides = [1, 1]} : vector<4x256xf32> to vector<1x256xf32>
    %169 = vector.broadcast %167 : f32 to vector<1x256xf32>
    %170 = arith.mulf %169, %168 : vector<1x256xf32>
    %171 = arith.addf %166, %170 : vector<1x256xf32>
    %c0_58 = arith.constant 0 : index
    %c1_59 = arith.constant 1 : index
    %172 = memref.load %arg5[%c0_58, %c1_59] : memref<4x4xf32, #tpu.memory_space<smem>>
    %173 = vector.extract_strided_slice %164 {offsets = [1, 0], sizes = [1, 256], strides = [1, 1]} : vector<4x256xf32> to vector<1x256xf32>
    %174 = vector.broadcast %172 : f32 to vector<1x256xf32>
    %175 = arith.mulf %174, %173 : vector<1x256xf32>
    %176 = arith.addf %171, %175 : vector<1x256xf32>
    %c0_60 = arith.constant 0 : index
    %c2_61 = arith.constant 2 : index
    %177 = memref.load %arg5[%c0_60, %c2_61] : memref<4x4xf32, #tpu.memory_space<smem>>
    %178 = vector.extract_strided_slice %164 {offsets = [2, 0], sizes = [1, 256], strides = [1, 1]} : vector<4x256xf32> to vector<1x256xf32>
    %179 = vector.broadcast %177 : f32 to vector<1x256xf32>
    %180 = arith.mulf %179, %178 : vector<1x256xf32>
    %181 = arith.addf %176, %180 : vector<1x256xf32>
    %c0_62 = arith.constant 0 : index
    %c3_63 = arith.constant 3 : index
    %182 = memref.load %arg5[%c0_62, %c3_63] : memref<4x4xf32, #tpu.memory_space<smem>>
    %183 = vector.extract_strided_slice %164 {offsets = [3, 0], sizes = [1, 256], strides = [1, 1]} : vector<4x256xf32> to vector<1x256xf32>
    %184 = vector.broadcast %182 : f32 to vector<1x256xf32>
    %185 = arith.mulf %184, %183 : vector<1x256xf32>
    %186 = arith.addf %181, %185 : vector<1x256xf32>
    %187 = arith.index_cast %145 : i32 to index
    %c0_64 = arith.constant 0 : index
    %188 = memref.load %arg4[%187, %c0_64] : memref<2x4xf32, #tpu.memory_space<smem>>
    %189 = vector.broadcast %188 : f32 to vector<1x256xf32>
    %190 = arith.addf %186, %189 : vector<1x256xf32>
    %191 = vector.extract_strided_slice %155 {offsets = [0, 0], sizes = [1, 256], strides = [1, 1]} : vector<4x256xf32> to vector<1x256xf32>
    %192 = arith.subf %190, %191 : vector<1x256xf32>
    %193 = arith.mulf %192, %192 : vector<1x256xf32>
    %194 = arith.addf %165, %193 : vector<1x256xf32>
    %cst_65 = arith.constant 0.000000e+00 : f32
    %195 = vector.broadcast %cst_65 : f32 to vector<1x256xf32>
    %c1_66 = arith.constant 1 : index
    %c0_67 = arith.constant 0 : index
    %196 = memref.load %arg5[%c1_66, %c0_67] : memref<4x4xf32, #tpu.memory_space<smem>>
    %197 = vector.extract_strided_slice %164 {offsets = [0, 0], sizes = [1, 256], strides = [1, 1]} : vector<4x256xf32> to vector<1x256xf32>
    %198 = vector.broadcast %196 : f32 to vector<1x256xf32>
    %199 = arith.mulf %198, %197 : vector<1x256xf32>
    %200 = arith.addf %195, %199 : vector<1x256xf32>
    %c1_68 = arith.constant 1 : index
    %c1_69 = arith.constant 1 : index
    %201 = memref.load %arg5[%c1_68, %c1_69] : memref<4x4xf32, #tpu.memory_space<smem>>
    %202 = vector.extract_strided_slice %164 {offsets = [1, 0], sizes = [1, 256], strides = [1, 1]} : vector<4x256xf32> to vector<1x256xf32>
    %203 = vector.broadcast %201 : f32 to vector<1x256xf32>
    %204 = arith.mulf %203, %202 : vector<1x256xf32>
    %205 = arith.addf %200, %204 : vector<1x256xf32>
    %c1_70 = arith.constant 1 : index
    %c2_71 = arith.constant 2 : index
    %206 = memref.load %arg5[%c1_70, %c2_71] : memref<4x4xf32, #tpu.memory_space<smem>>
    %207 = vector.extract_strided_slice %164 {offsets = [2, 0], sizes = [1, 256], strides = [1, 1]} : vector<4x256xf32> to vector<1x256xf32>
    %208 = vector.broadcast %206 : f32 to vector<1x256xf32>
    %209 = arith.mulf %208, %207 : vector<1x256xf32>
    %210 = arith.addf %205, %209 : vector<1x256xf32>
    %c1_72 = arith.constant 1 : index
    %c3_73 = arith.constant 3 : index
    %211 = memref.load %arg5[%c1_72, %c3_73] : memref<4x4xf32, #tpu.memory_space<smem>>
    %212 = vector.extract_strided_slice %164 {offsets = [3, 0], sizes = [1, 256], strides = [1, 1]} : vector<4x256xf32> to vector<1x256xf32>
    %213 = vector.broadcast %211 : f32 to vector<1x256xf32>
    %214 = arith.mulf %213, %212 : vector<1x256xf32>
    %215 = arith.addf %210, %214 : vector<1x256xf32>
    %216 = arith.index_cast %145 : i32 to index
    %c1_74 = arith.constant 1 : index
    %217 = memref.load %arg4[%216, %c1_74] : memref<2x4xf32, #tpu.memory_space<smem>>
    %218 = vector.broadcast %217 : f32 to vector<1x256xf32>
    %219 = arith.addf %215, %218 : vector<1x256xf32>
    %220 = vector.extract_strided_slice %155 {offsets = [1, 0], sizes = [1, 256], strides = [1, 1]} : vector<4x256xf32> to vector<1x256xf32>
    %221 = arith.subf %219, %220 : vector<1x256xf32>
    %222 = arith.mulf %221, %221 : vector<1x256xf32>
    %223 = arith.addf %194, %222 : vector<1x256xf32>
    %cst_75 = arith.constant 0.000000e+00 : f32
    %224 = vector.broadcast %cst_75 : f32 to vector<1x256xf32>
    %c2_76 = arith.constant 2 : index
    %c0_77 = arith.constant 0 : index
    %225 = memref.load %arg5[%c2_76, %c0_77] : memref<4x4xf32, #tpu.memory_space<smem>>
    %226 = vector.extract_strided_slice %164 {offsets = [0, 0], sizes = [1, 256], strides = [1, 1]} : vector<4x256xf32> to vector<1x256xf32>
    %227 = vector.broadcast %225 : f32 to vector<1x256xf32>
    %228 = arith.mulf %227, %226 : vector<1x256xf32>
    %229 = arith.addf %224, %228 : vector<1x256xf32>
    %c2_78 = arith.constant 2 : index
    %c1_79 = arith.constant 1 : index
    %230 = memref.load %arg5[%c2_78, %c1_79] : memref<4x4xf32, #tpu.memory_space<smem>>
    %231 = vector.extract_strided_slice %164 {offsets = [1, 0], sizes = [1, 256], strides = [1, 1]} : vector<4x256xf32> to vector<1x256xf32>
    %232 = vector.broadcast %230 : f32 to vector<1x256xf32>
    %233 = arith.mulf %232, %231 : vector<1x256xf32>
    %234 = arith.addf %229, %233 : vector<1x256xf32>
    %c2_80 = arith.constant 2 : index
    %c2_81 = arith.constant 2 : index
    %235 = memref.load %arg5[%c2_80, %c2_81] : memref<4x4xf32, #tpu.memory_space<smem>>
    %236 = vector.extract_strided_slice %164 {offsets = [2, 0], sizes = [1, 256], strides = [1, 1]} : vector<4x256xf32> to vector<1x256xf32>
    %237 = vector.broadcast %235 : f32 to vector<1x256xf32>
    %238 = arith.mulf %237, %236 : vector<1x256xf32>
    %239 = arith.addf %234, %238 : vector<1x256xf32>
    %c2_82 = arith.constant 2 : index
    %c3_83 = arith.constant 3 : index
    %240 = memref.load %arg5[%c2_82, %c3_83] : memref<4x4xf32, #tpu.memory_space<smem>>
    %241 = vector.extract_strided_slice %164 {offsets = [3, 0], sizes = [1, 256], strides = [1, 1]} : vector<4x256xf32> to vector<1x256xf32>
    %242 = vector.broadcast %240 : f32 to vector<1x256xf32>
    %243 = arith.mulf %242, %241 : vector<1x256xf32>
    %244 = arith.addf %239, %243 : vector<1x256xf32>
    %245 = arith.index_cast %145 : i32 to index
    %c2_84 = arith.constant 2 : index
    %246 = memref.load %arg4[%245, %c2_84] : memref<2x4xf32, #tpu.memory_space<smem>>
    %247 = vector.broadcast %246 : f32 to vector<1x256xf32>
    %248 = arith.addf %244, %247 : vector<1x256xf32>
    %249 = vector.extract_strided_slice %155 {offsets = [2, 0], sizes = [1, 256], strides = [1, 1]} : vector<4x256xf32> to vector<1x256xf32>
    %250 = arith.subf %248, %249 : vector<1x256xf32>
    %251 = arith.mulf %250, %250 : vector<1x256xf32>
    %252 = arith.addf %223, %251 : vector<1x256xf32>
    %cst_85 = arith.constant 0.000000e+00 : f32
    %253 = vector.broadcast %cst_85 : f32 to vector<1x256xf32>
    %c3_86 = arith.constant 3 : index
    %c0_87 = arith.constant 0 : index
    %254 = memref.load %arg5[%c3_86, %c0_87] : memref<4x4xf32, #tpu.memory_space<smem>>
    %255 = vector.extract_strided_slice %164 {offsets = [0, 0], sizes = [1, 256], strides = [1, 1]} : vector<4x256xf32> to vector<1x256xf32>
    %256 = vector.broadcast %254 : f32 to vector<1x256xf32>
    %257 = arith.mulf %256, %255 : vector<1x256xf32>
    %258 = arith.addf %253, %257 : vector<1x256xf32>
    %c3_88 = arith.constant 3 : index
    %c1_89 = arith.constant 1 : index
    %259 = memref.load %arg5[%c3_88, %c1_89] : memref<4x4xf32, #tpu.memory_space<smem>>
    %260 = vector.extract_strided_slice %164 {offsets = [1, 0], sizes = [1, 256], strides = [1, 1]} : vector<4x256xf32> to vector<1x256xf32>
    %261 = vector.broadcast %259 : f32 to vector<1x256xf32>
    %262 = arith.mulf %261, %260 : vector<1x256xf32>
    %263 = arith.addf %258, %262 : vector<1x256xf32>
    %c3_90 = arith.constant 3 : index
    %c2_91 = arith.constant 2 : index
    %264 = memref.load %arg5[%c3_90, %c2_91] : memref<4x4xf32, #tpu.memory_space<smem>>
    %265 = vector.extract_strided_slice %164 {offsets = [2, 0], sizes = [1, 256], strides = [1, 1]} : vector<4x256xf32> to vector<1x256xf32>
    %266 = vector.broadcast %264 : f32 to vector<1x256xf32>
    %267 = arith.mulf %266, %265 : vector<1x256xf32>
    %268 = arith.addf %263, %267 : vector<1x256xf32>
    %c3_92 = arith.constant 3 : index
    %c3_93 = arith.constant 3 : index
    %269 = memref.load %arg5[%c3_92, %c3_93] : memref<4x4xf32, #tpu.memory_space<smem>>
    %270 = vector.extract_strided_slice %164 {offsets = [3, 0], sizes = [1, 256], strides = [1, 1]} : vector<4x256xf32> to vector<1x256xf32>
    %271 = vector.broadcast %269 : f32 to vector<1x256xf32>
    %272 = arith.mulf %271, %270 : vector<1x256xf32>
    %273 = arith.addf %268, %272 : vector<1x256xf32>
    %274 = arith.index_cast %145 : i32 to index
    %c3_94 = arith.constant 3 : index
    %275 = memref.load %arg4[%274, %c3_94] : memref<2x4xf32, #tpu.memory_space<smem>>
    %276 = vector.broadcast %275 : f32 to vector<1x256xf32>
    %277 = arith.addf %273, %276 : vector<1x256xf32>
    %278 = vector.extract_strided_slice %155 {offsets = [3, 0], sizes = [1, 256], strides = [1, 1]} : vector<4x256xf32> to vector<1x256xf32>
    %279 = arith.subf %277, %278 : vector<1x256xf32>
    %280 = arith.mulf %279, %279 : vector<1x256xf32>
    %281 = arith.addf %252, %280 : vector<1x256xf32>
    %282 = vector.broadcast %151 : f32 to vector<1x256xf32>
    %283 = arith.mulf %282, %281 : vector<1x256xf32>
    %284 = arith.addf %143, %283 : vector<1x256xf32>
    %285 = vector.shape_cast %284 : vector<1x256xf32> to vector<1x1x256xf32>
    %cst_95 = arith.constant dense<0.000000e+00> : vector<1xf32>
    %286 = vector.multi_reduction <add>, %285, %cst_95 [1, 2] : vector<1x1x256xf32> to vector<1xf32>
    %287 = vector.shape_cast %286 : vector<1xf32> to vector<1x1x1xf32>
    %288 = vector.extract %287[0, 0, 0] : f32 from vector<1x1x1xf32>
    %cst_96 = arith.constant 1.000000e+00 : f32
    %289 = vector.broadcast %cst_96 : f32 to vector<8x128xf32>
    %290 = vector.broadcast %288 : f32 to vector<8x128xf32>
    %291 = arith.mulf %290, %289 : vector<8x128xf32>
    %c0_97 = arith.constant 0 : index
    %c0_98 = arith.constant 0 : index
    %c0_99 = arith.constant 0 : index
    %292 = vector.load %arg9[%c0_97, %c0_98, %c0_99] : memref<1x8x128xf32, #tpu.memory_space<vmem>>, vector<1x8x128xf32>
    %293 = vector.shape_cast %292 : vector<1x8x128xf32> to vector<8x128xf32>
    %294 = vector.shape_cast %291 : vector<8x128xf32> to vector<1x8x128xf32>
    tpu.vector_store %arg9[%c0_97, %c0_98, %c0_99], %294 {strides = array<i32>} : memref<1x8x128xf32, #tpu.memory_space<vmem>>, vector<1x8x128xf32>,
    return
  }
  func.func @transform_0(%arg0: i32, %arg1: memref<2xf32, #tpu.memory_space<smem>>, %arg2: memref<2xf32, #tpu.memory_space<smem>>, %arg3: memref<2xf32, #tpu.memory_space<smem>>, %arg4: memref<2x4xf32, #tpu.memory_space<smem>>, %arg5: memref<4x4xf32, #tpu.memory_space<smem>>) -> (i32, i32, i32) {
    %c0_i32 = arith.constant 0 : i32
    %c0_i32_0 = arith.constant 0 : i32
    %c0_i32_1 = arith.constant 0 : i32
    return %arg0, %c0_i32, %c0_i32_0 : i32, i32, i32
  }
  func.func @transform_1(%arg0: i32, %arg1: memref<2xf32, #tpu.memory_space<smem>>, %arg2: memref<2xf32, #tpu.memory_space<smem>>, %arg3: memref<2xf32, #tpu.memory_space<smem>>, %arg4: memref<2x4xf32, #tpu.memory_space<smem>>, %arg5: memref<4x4xf32, #tpu.memory_space<smem>>) -> (i32, i32, i32) {
    %c0_i32 = arith.constant 0 : i32
    %c0_i32_0 = arith.constant 0 : i32
    %c0_i32_1 = arith.constant 0 : i32
    return %arg0, %c0_i32, %c0_i32_0 : i32, i32, i32
  }
  func.func @transform_2(%arg0: i32, %arg1: memref<2xf32, #tpu.memory_space<smem>>, %arg2: memref<2xf32, #tpu.memory_space<smem>>, %arg3: memref<2xf32, #tpu.memory_space<smem>>, %arg4: memref<2x4xf32, #tpu.memory_space<smem>>, %arg5: memref<4x4xf32, #tpu.memory_space<smem>>) -> (i32, i32) {
    %c0_i32 = arith.constant 0 : i32
    %c0_i32_0 = arith.constant 0 : i32
    %c0_i32_1 = arith.constant 0 : i32
    return %c0_i32, %c0_i32_0 : i32, i32
  }
  func.func @transform_3(%arg0: i32, %arg1: memref<2xf32, #tpu.memory_space<smem>>, %arg2: memref<2xf32, #tpu.memory_space<smem>>, %arg3: memref<2xf32, #tpu.memory_space<smem>>, %arg4: memref<2x4xf32, #tpu.memory_space<smem>>, %arg5: memref<4x4xf32, #tpu.memory_space<smem>>) -> (i32, i32, i32) {
    %c0_i32 = arith.constant 0 : i32
    %c0_i32_0 = arith.constant 0 : i32
    %c0_i32_1 = arith.constant 0 : i32
    return %arg0, %c0_i32, %c0_i32_0 : i32, i32, i32
  }
}

</mosaic_0001>

<bundles_post_ra>
// kernel: tpu_custom_call.1
= control target key start
LH: loop header
LB: loop body
LE: loop exit
PB: predicated region body
PF: predicated region fallthrough
CT: control target
= control target key end

     0   :  { %s644_s11 = smov [#allocation3]   ;;  %s645_s12 = smov [#allocation4]   ;;  %s908_s0 = inlined_call_operand.hbm [shape: f32[2], index: 0, kind: input, shape index: {}]   ;;  %s909_s5 = inlined_call_operand.hbm [shape: f32[2,4,256], index: 5, kind: input, shape index: {}]   ;;  %s910_s6 = inlined_call_operand.hbm [shape: f32[2,4,256], index: 6, kind: input, shape index: {}]   ;;  %s911_s7 = inlined_call_operand.vmem [shape: f32[2,256], index: 7, kind: input, shape index: {}]   ;;  %s912_s8 = inlined_call_operand.hbm [shape: f32[1,8,128], index: 8, kind: output, shape index: {}]   ;;  %s913_s1 = inlined_call_operand.hbm [shape: f32[2], index: 1, kind: input, shape index: {}]   ;;  %s914_s2 = inlined_call_operand.hbm [shape: f32[2], index: 2, kind: input, shape index: {}]   ;;  %s915_s3 = inlined_call_operand.vmem [shape: f32[2,4], index: 3, kind: input, shape index: {}]   ;;  %s916_s4 = inlined_call_operand.hbm [shape: f32[4,4], index: 4, kind: input, shape index: {}]  }
   0x1   :  { %s14_s29 = sshll.u32 %s908_s0, 4  ;;  %s19_s10 = sshll.u32 %s913_s1, 4  ;;  %s15_s29 = int_to_ptr.hbm [resolvable:$true] %s14_s29  ;;  %s20_s10 = int_to_ptr.hbm [resolvable:$true] %s19_s10 }
   0x2   :  { %17 = dma.hbm_to_smem %s15_s29, 16, %s644_s11, [#allocation2] }
   0x3   :  { %22 = dma.hbm_to_smem %s20_s10, 16, %s645_s12, [#allocation2] }
   0x4   :  { %s24_s15 = sshll.u32 %s914_s2, 4  ;;  %s29_s18 = sshll.u32 %s915_s3, 4  ;;  %s25_s15 = int_to_ptr.hbm [resolvable:$true] %s24_s15  ;;  %s30_s18 = int_to_ptr.vmem [resolvable:$true] %s29_s18 }
   0x5   :  { %s646_s0 = smov [#allocation5]   ;;  %s647_s19 = smov [#allocation6]  }
   0x6   :  { %27 = dma.hbm_to_smem %s25_s15, 16, %s646_s0, [#allocation2] }
   0x7   :  { %32 = dma.vmem_to_smem %s30_s18, 32, %s647_s19, [#allocation2] }
   0x8   :  { %s34_s21 = sshll.u32 %s916_s4, 4  ;;  %s648_s22 = smov [#allocation7]   ;;  %s35_s21 = int_to_ptr.hbm [resolvable:$true] %s34_s21 }
   0x9   :  { %37 = dma.hbm_to_smem %s35_s21, 64, %s648_s22, [#allocation2] }
   0xa   :  { %636 = dma.done.wait [#allocation2], 144 }
   0xb   :  { %637 = vsyncadd [#allocation2], 4294967152 }
   0xc   :  { %40 = sfence }
   0xd   :  { %41 = vsyncpa [#allocation9], 0 }
   0xe   :  { %42 = vsyncpa [#allocation12], 0 }
   0xf   :  { %43 = vsyncpa [#allocation10], 0  ;;  %s48_s23 = sshll.u32 %s909_s5, 4  ;;  %s649_s24 = smov [#allocation8]   ;;  %s49_s23 = int_to_ptr.hbm [resolvable:$true] %s48_s23 }
  0x10   :  { %s50_s25 = sshll.u32 %s649_s24, 4  ;;  %s61_s4 = sshll.u32 %s910_s6, 4  ;;  %s51_s25 = int_to_ptr.vmem [resolvable:$true] %s50_s25  ;;  %s62_s4 = int_to_ptr.hbm [resolvable:$true] %s61_s4 }
  0x11   :  { %s650_s28 = smov 128   ;;  %s651_s29 = smov 8  }
  0x12   :  { %56 = dma.hbm_to_vmem [thread:$0]  %s49_s23, 256, %s51_s25, [#allocation9], %s650_s28, %s650_s28, %s651_s29  }
  0x13   :  { %s652_s30 = smov [#allocation11]  }
  0x14   :  { %s63_s9 = sshll.u32 %s652_s30, 4  ;;  %s64_s9 = int_to_ptr.vmem [resolvable:$true] %s63_s9 }
  0x15   :  { %69 = dma.hbm_to_vmem [thread:$0]  %s62_s4, 256, %s64_s9, [#allocation12], %s650_s28, %s650_s28, %s651_s29  }
  0x16   :  { %638 = dma.done.wait [#allocation9], 256  }
  0x17   :  { %639 = vsyncadd [#allocation9], 4294967040 }
  0x18   :  { %640 = dma.done.wait [#allocation12], 256  }
  0x19   :  { %641 = vsyncadd [#allocation12], 4294967040  ;;  %s720_s5 = sld [smem:[#allocation3]]  ;;  %v80_v0 = vld [vmem:[%s911_s7] ss:$2 sm:$0x3] }
  0x1a   :  { %s85_s10 = sld [smem:[#allocation4]]  ;;  %v436_v1 = vld [vmem:[%s911_s7 + $0x1] ss:$2 sm:$0x3]  ;;  %v90_v2 = vperm.slane %v80_v0, 0  ;;  %v91_v3 = vperm.slane %v80_v0, 1 }
  0x1b   :  { %s722_s11 = sld [smem:[#allocation7]]  ;;  %v98_v4 = vperm.slane %v436_v1, 0  ;;  %v99_v5 = vperm.slane %v436_v1, 1  ;;  %vm93_vm0 = vcmask 1043456   ;;  %v87_v6 = vld [vmem:[#allocation8] sm:$0xff]  ;;  %v740_v9 = vld [vmem:[#allocation11] sm:$0xff] }
  0x1c   :  { %s724_s12 = sld [smem:[#allocation7 + $0x1]]  ;;  %v92_v7 = vrot.slane %v91_v3, 4  ;;  %v267_v17 = vld [vmem:[#allocation8 + $0x8] sm:$0xff]  ;;  %v451_v29 = vrot.slane %v740_v9, 9  ;;  %vm403_vm1 = vcmask 1040384   ;;  %s653_s6 = smov [#allocation13]  }
  0x1d   :  { %s732_s16 = sld [smem:[#allocation7 + $0x2]]  ;;  %v100_v8 = vrot.slane %v99_v5, 4  ;;  %s423_s13 = sshll.u32 %s653_s6, 4  ;;  %s424_s13 = int_to_ptr.vmem [resolvable:$true] %s423_s13 }
  0x1e   :  { %s734_s17 = sld [smem:[#allocation7 + $0x3]]  ;;  %v94_v10 = vsel %vm93_vm0, %v90_v2, %v92_v7 }
  0x1f   :  { %s736_s18 = sld [smem:[#allocation6]]  ;;  %v101_v11 = vsel %vm93_vm0, %v98_v4, %v100_v8  ;;  %v96_v13 = vsub.f32 %v87_v6, %v94_v10  ;;  %v104_v14 = vstv %s720_s5  ;;  %v270_v23 = vsub.f32 %v267_v17, %v94_v10 }
  0x20   :  { %s738_s0 = sld [smem:[#allocation7 + $0x80]]  ;;  %v106_v12 = vstv %s85_s10 }
  0x21   :  { %s742_s7 = sld [smem:[#allocation7 + $0x81]]  ;;  %v103_v15 = vmul.f32 %v101_v11, %v96_v13  ;;  %v107_v16 = vmul.f32 %v106_v12, %v740_v9  ;;  %v110_v19 = vstv %s722_s11  ;;  %v271_v41 = vmul.f32 %v270_v23, %v101_v11  ;;  %v844_v13 = vld [vmem:[#allocation11 + $0x8] sm:$0xff] }
  0x22   :  { %s744_s19 = sld [smem:[#allocation7 + $0x82]]  ;;  %v114_v20 = vstv %s724_s12 }
  0x23   :  { %s747_s1 = sld [smem:[#allocation7 + $0x83]]  ;;  %v105_v18 = vmul.f32 %v104_v14, %v103_v15  ;;  %v122_v21 = vstv %s732_s16  ;;  %s425_s16 = sshll.u32 %s912_s8, 4  ;;  %s426_s16 = int_to_ptr.hbm [resolvable:$true] %s425_s16 }
  0x24   :  { %s750_s20 = sld [smem:[#allocation6 + $0x1]]  ;;  %v130_v22 = vstv %s734_s17 }
  0x25   :  { %s752_s21 = sld [smem:[#allocation7 + $0x100]]  ;;  %v762_v24 = vadd.f32 %v107_v16, %v105_v18  ;;  %v139_v55 = vstv %s736_s18 }
  0x26   :  { %s755_s22 = sld [smem:[#allocation7 + $0x101]]  ;;  %v145_v25 = vstv %s738_s0 }
  0x27   :  { %s760_s2 = sld [smem:[#allocation7 + $0x102]]  ;;  %v149_v26 = vstv %s742_s7  ;;  %v111_v30 = vmul.f32 %v110_v19, %v762_v24  ;;  %v115_v31 = vmul.f32 %v114_v20, %v762_v24  ;;  %v123_v32 = vmul.f32 %v122_v21, %v762_v24 }
  0x28   :  { %v157_v27 = vstv %s744_s19  ;;  %s767_s3 = sld [smem:[#allocation7 + $0x103]]  ;;  %v131_v33 = vmul.f32 %v130_v22, %v762_v24  ;;  %v146_v34 = vmul.f32 %v145_v25, %v762_v24  ;;  %v150_v35 = vmul.f32 %v149_v26, %v762_v24 }
  0x29   :  { %v165_v28 = vstv %s747_s1  ;;  %s783_s23 = sld [smem:[#allocation7 + $0x180]]  ;;  %v158_v36 = vmul.f32 %v157_v27, %v762_v24  ;;  %v438_v38 = vrot.slane %v115_v31, 9  ;;  %v440_v39 = vrot.slane %v123_v32, 10 }
  0x2a   :  { %v166_v37 = vmul.f32 %v165_v28, %v762_v24  ;;  %s797_s24 = sld [smem:[#allocation7 + $0x181]]  ;;  %v442_v40 = vrot.slane %v131_v33, 11  ;;  %v445_v42 = vrot.slane %v150_v35, 9  ;;  %v174_v56 = vstv %s750_s20 }
  0x2b   :  { %s799_s25 = sld [smem:[#allocation7 + $0x182]]  ;;  %v447_v43 = vrot.slane %v158_v36, 10  ;;  %v184_v45 = vstv %s752_s21  ;;  %v120_v46 = vadd.f32 %v438_v38, %v111_v30  ;;  %v460_v33 = vrot.slane %v740_v9, 10 }
  0x2c   :  { %v449_v44 = vrot.slane %v166_v37, 11  ;;  %s802_s26 = sld [smem:[#allocation7 + $0x183]]  ;;  %v185_v47 = vmul.f32 %v184_v45, %v762_v24  ;;  %v188_v48 = vstv %s755_s22  ;;  %v155_v50 = vadd.f32 %v445_v42, %v146_v34 }
  0x2d   :  { %v196_v49 = vstv %s760_s2  ;;  %v189_v51 = vmul.f32 %v188_v48, %v762_v24  ;;  %s816_s27 = sld [smem:[#allocation3 + $0x1]]  ;;  %v128_v54 = vadd.f32 %v440_v39, %v120_v46  ;;  %v469_v34 = vrot.slane %v740_v9, 11 }
  0x2e   :  { %v197_v52 = vmul.f32 %v196_v49, %v762_v24  ;;  %v204_v53 = vstv %s767_s3  ;;  %s821_s4 = sld [smem:[#allocation4 + $0x1]]  ;;  %v163_v58 = vadd.f32 %v447_v43, %v155_v50 }
  0x2f   :  { %v222_v57 = vstv %s783_s23  ;;  %v454_v59 = vrot.slane %v189_v51, 9  ;;  %v205_v61 = vmul.f32 %v204_v53, %v762_v24  ;;  %s826_s28 = sld [smem:[#allocation6 + $0x2]]  ;;  %v136_v62 = vadd.f32 %v442_v40, %v128_v54 }
  0x30   :  { %v456_v60 = vrot.slane %v197_v52, 10  ;;  %v223_v63 = vmul.f32 %v222_v57, %v762_v24  ;;  %v226_v0 = vstv %s797_s24  ;;  %s833_s29 = sld [smem:[#allocation6 + $0x3]]  ;;  %v171_v2 = vadd.f32 %v449_v44, %v163_v58 }
  0x31   :  { %v234_v1 = vstv %s799_s25  ;;  %v194_v3 = vadd.f32 %v454_v59, %v185_v47  ;;  %v227_v4 = vmul.f32 %v226_v0, %v762_v24  ;;  %s841_s30 = sld [smem:[#allocation6 + $0x80]]  ;;  %v140_v6 = vadd.f32 %v139_v55, %v136_v62 }
  0x32   :  { %v235_v5 = vmul.f32 %v234_v1, %v762_v24  ;;  %v242_v7 = vstv %s802_s26  ;;  %v175_v8 = vadd.f32 %v174_v56, %v171_v2  ;;  %v458_v11 = vrot.slane %v205_v61, 11  ;;  %s846_s9 = sld [smem:[#allocation6 + $0x81]] }
  0x33   :  { %v202_v10 = vadd.f32 %v456_v60, %v194_v3  ;;  %v463_v12 = vrot.slane %v227_v4, 9  ;;  %v243_v15 = vmul.f32 %v242_v7, %v762_v24  ;;  %v272_v16 = vstv %s816_s27  ;;  %s856_s5 = sld [smem:[#allocation6 + $0x82]] }
  0x34   :  { %v465_v14 = vrot.slane %v235_v5, 10  ;;  %v274_v17 = vstv %s821_s4  ;;  %v141_v18 = vsub.f32 %v140_v6, %v740_v9  ;;  %v180_v23 = vsub.f32 %v175_v8, %v451_v29  ;;  %s891_s10 = sld [smem:[#allocation6 + $0x83]] }
  0x35   :  { %v232_v30 = vadd.f32 %v463_v12, %v223_v63  ;;  %v273_v31 = vmul.f32 %v272_v16, %v271_v41  ;;  %v275_v32 = vmul.f32 %v274_v17, %v844_v13  ;;  %v210_v24 = vadd.f32 %v458_v11, %v202_v10  ;;  %s86_s11 = sld [smem:[#allocation5]] }
  0x36   :  { %v481_v29 = vrot.slane %v844_v13, 9  ;;  %v213_v35 = vstv %s826_s28  ;;  %v467_v37 = vrot.slane %v243_v15, 11  ;;  %v142_v39 = vmul.f32 %v141_v18, %v141_v18  ;;  %s472_s12 = sld [smem:[#allocation5 + $0x1]] }
  0x37   :  { %v240_v36 = vadd.f32 %v465_v14, %v232_v30  ;;  %v276_v38 = vadd.f32 %v275_v32, %v273_v31  ;;  %v181_v40 = vmul.f32 %v180_v23, %v180_v23  ;;  %v251_v41 = vstv %s833_s29 }
  0x38   :  { %v299_v42 = vstv %s841_s30  ;;  %v214_v47 = vadd.f32 %v213_v35, %v210_v24  ;;  %v326_v52 = vstv %s846_s9 }
  0x39   :  { %v277_v43 = vmul.f32 %v276_v38, %v110_v19  ;;  %v279_v44 = vmul.f32 %v276_v38, %v114_v20  ;;  %v285_v9 = vmul.f32 %v276_v38, %v122_v21  ;;  %v291_v46 = vmul.f32 %v276_v38, %v130_v22 }
  0x3a   :  { %v304_v50 = vmul.f32 %v276_v38, %v145_v25  ;;  %v306_v51 = vmul.f32 %v276_v38, %v149_v26  ;;  %v248_v54 = vadd.f32 %v467_v37, %v240_v36  ;;  %v312_v19 = vmul.f32 %v276_v38, %v157_v27 }
  0x3b   :  { %v473_v55 = vrot.slane %v279_v44, 9  ;;  %v474_v56 = vrot.slane %v285_v9, 10  ;;  %v475_v20 = vrot.slane %v291_v46, 11  ;;  %v318_v21 = vmul.f32 %v276_v38, %v165_v28 }
  0x3c   :  { %v477_v58 = vrot.slane %v306_v51, 9  ;;  %v357_v59 = vstv %s856_s5  ;;  %v478_v60 = vrot.slane %v312_v19, 10  ;;  %v335_v25 = vmul.f32 %v276_v38, %v184_v45 }
  0x3d   :  { %v284_v22 = vadd.f32 %v473_v55, %v277_v43  ;;  %v337_v26 = vmul.f32 %v276_v38, %v188_v48  ;;  %v218_v61 = vsub.f32 %v214_v47, %v460_v33  ;;  %v479_v63 = vrot.slane %v318_v21, 11 }
  0x3e   :  { %v311_v62 = vadd.f32 %v477_v58, %v304_v50  ;;  %v343_v27 = vmul.f32 %v276_v38, %v196_v49  ;;  %v252_v2 = vadd.f32 %v251_v41, %v248_v54  ;;  %v349_v28 = vmul.f32 %v276_v38, %v204_v53 }
  0x3f   :  { %v290_v3 = vadd.f32 %v474_v56, %v284_v22  ;;  %v482_v4 = vrot.slane %v337_v26, 9  ;;  %v365_v45 = vmul.f32 %v276_v38, %v222_v57  ;;  %v367_v48 = vmul.f32 %v276_v38, %v226_v0 }
  0x40   :  { %v317_v5 = vadd.f32 %v478_v60, %v311_v62  ;;  %v483_v6 = vrot.slane %v343_v27, 10  ;;  %v484_v11 = vrot.slane %v349_v28, 11  ;;  %v373_v12 = vmul.f32 %v276_v38, %v234_v1 }
  0x41   :  { %v296_v8 = vadd.f32 %v475_v20, %v290_v3  ;;  %v342_v10 = vadd.f32 %v482_v4, %v335_v25  ;;  %v182_v49 = vadd.f32 %v181_v40, %v142_v39  ;;  %v487_v15 = vrot.slane %v367_v48, 9 }
  0x42   :  { %v323_v14 = vadd.f32 %v479_v63, %v317_v5  ;;  %v379_v16 = vmul.f32 %v276_v38, %v242_v7  ;;  %v219_v17 = vmul.f32 %v218_v61, %v218_v61  ;;  %v488_v23 = vrot.slane %v373_v12, 10 }
  0x43   :  { %v300_v53 = vadd.f32 %v299_v42, %v296_v8  ;;  %v348_v18 = vadd.f32 %v483_v6, %v342_v10  ;;  %v256_v30 = vsub.f32 %v252_v2, %v469_v34  ;;  %v372_v57 = vadd.f32 %v487_v15, %v365_v45 }
  0x44   :  { %v327_v31 = vadd.f32 %v326_v52, %v323_v14  ;;  %v489_v32 = vrot.slane %v379_v16, 11  ;;  %v486_v1 = vrot.slane %v844_v13, 10  ;;  %v387_v37 = vstv %s891_s10 }
  0x45   :  { %v301_v0 = vsub.f32 %v300_v53, %v844_v13  ;;  %v354_v24 = vadd.f32 %v484_v11, %v348_v18  ;;  %v378_v35 = vadd.f32 %v488_v23, %v372_v57  ;;  %v491_v38 = vrot.slane %v844_v13, 11 }
  0x46   :  { %v332_v33 = vsub.f32 %v327_v31, %v481_v29  ;;  %v220_v39 = vadd.f32 %v219_v17, %v182_v49  ;;  %v257_v40 = vmul.f32 %v256_v30, %v256_v30  ;;  %v259_v50 = vstv %s86_s11 }
  0x47   :  { %v302_v36 = vmul.f32 %v301_v0, %v301_v0  ;;  %v358_v7 = vadd.f32 %v357_v59, %v354_v24  ;;  %v384_v41 = vadd.f32 %v489_v32, %v378_v35  ;;  %v395_v52 = vstv %s472_s12 }
  0x48   :  { %v333_v34 = vmul.f32 %v332_v33, %v332_v33  ;;  %v258_v46 = vadd.f32 %v257_v40, %v220_v39 }
  0x49   :  { %v362_v42 = vsub.f32 %v358_v7, %v486_v1  ;;  %v388_v44 = vadd.f32 %v387_v37, %v384_v41 }
  0x4a   :  { %v334_v43 = vadd.f32 %v333_v34, %v302_v36  ;;  %v260_v54 = vmul.f32 %v259_v50, %v258_v46 }
  0x4b   :  { %v363_v9 = vmul.f32 %v362_v42, %v362_v42  ;;  %v392_v47 = vsub.f32 %v388_v44, %v491_v38 }
  0x4d   :  { %v364_v51 = vadd.f32 %v363_v9, %v334_v43  ;;  %v393_v29 = vmul.f32 %v392_v47, %v392_v47 }
  0x4f   :  { %v394_v55 = vadd.f32 %v393_v29, %v364_v51 }
  0x51   :  { %v396_v56 = vmul.f32 %v395_v52, %v394_v55 }
  0x53   :  { %v397_v19 = vadd.f32 %v396_v56, %v260_v54 }
  0x55   :  { %v399_v13 = vperm.slane %v397_v19, 0  ;;  %v400_v20 = vperm.slane %v397_v19, 4 }
  0x57   :  { %v404_v58 = vsel %vm403_vm1, %v399_v13, 0.0  ;;  %v405_v21 = vsel %vm403_vm1, %v400_v20, 0.0 }
  0x58   :  { %v406_v59 = vadd.f32 %v405_v21, %v404_v58 }
  0x5a   :  { %407 = vadd.xlane.f32.xlu0 %v406_v59 }
  0xcd   :  { %v408_v22 = vpop.xlane.xlu0 %407 }
  0xce   :  { %v409_v60 = vrot.slane %v408_v22, 4 }
  0xd0   :  { %v410_v25 = vadd.f32 %v409_v60, %v408_v22 }
  0xd2   :  { %v411_v26 = vrot.slane %v410_v25, 2 }
  0xd4   :  { %v412_v61 = vadd.f32 %v411_v26, %v410_v25 }
  0xd6   :  { %v413_v62 = vrot.slane %v412_v61, 1 }
  0xd8   :  { %v414_v63 = vadd.f32 %v413_v62, %v412_v61 }
  0xda   :  { %492 = vpush %v414_v63 }
 0x10b   :  { %s493_s17 = spop %492 }
 0x10c   :  { %v416_v27 = vstv %s493_s17 }
 0x10d   :  { %417 = vst [vmem:[#allocation13] sm:$0xff] %v416_v27 }
 0x10e   :  { %428 = dma.vmem_to_hbm [thread:$0]  %s424_s13, 128, %s426_s16, [#allocation10]  }
 0x10f   :  { %642 = dma.done.wait [#allocation10], 128  }
 0x110   :  { %643 = vsyncadd [#allocation10], 4294967168 }
 0x111   :  { %433 = vsyncpa [#allocation9], 1 }
 0x112   :  { %434 = vsyncpa [#allocation12], 1 }
 0x113   :  { %435 = vsyncpa [#allocation10], 1 }

</bundles_post_ra>
